<compile_context>
chip_gen: v5e
topology: v5e:2x2
jax: 0.10.0
libtpu: 0.0.40
codegen_flags: <defaults>
</compile_context>

<pallas_src>
import functools

import jax
import jax.numpy as jnp
from jax.experimental import pallas as pl
from jax.experimental.pallas import tpu as pltpu


def _round_up(v, m):
    return (v + m - 1) // m * m


def _pick_tile(n_p, cap):
    """Largest multiple of 128 that divides n_p and is <= max(cap, 128).

    n_p must itself be a multiple of 128, so this always terminates at 128.
    """
    t = min(cap - cap % 128, n_p)
    t = max(t, 128)
    while n_p % t:
        t -= 128
    return t


# ----------------------------------------------------------------------------
# Stage 1: H_cat[:, b*chid_p:(b+1)*chid_p] = x[b] @ W + bias   (bf16 output)
# ----------------------------------------------------------------------------
def _feature_transform_kernel(x_ref, w_ref, b_ref, h_ref, *, chid_p):
    w = w_ref[...]          # (Cin, chid_p)   f32
    bias = b_ref[...]       # (1,  chid_p)    f32
    # Small static batch unroll; each per-batch result lands in a lane-aligned
    # 128-multiple column slice of the concatenated H output.
    for b in range(x_ref.shape[0]):
        h = jnp.dot(x_ref[b], w, preferred_element_type=jnp.float32) + bias
        h_ref[:, b * chid_p:(b + 1) * chid_p] = h.astype(h_ref.dtype)


# ----------------------------------------------------------------------------
# Stage 2: out_cat = Adj @ H_cat   (bf16 MXU inputs, f32 accumulation)
# ----------------------------------------------------------------------------
def _adj_matmul_kernel(adj_ref, h_ref, o_ref, *, tk, h_resident):
    k = pl.program_id(1)

    @pl.when(k == 0)
    def _():
        o_ref[...] = jnp.zeros_like(o_ref)

    if h_resident:
        # H is fully VMEM-resident (constant index_map); slice the k-tile.
        start = pl.multiple_of(k * tk, 128)
        h_blk = h_ref[pl.ds(start, tk), :]
    else:
        h_blk = h_ref[...]

    # Output block index is constant along k -> o_ref is the accumulator.
    o_ref[...] += jnp.dot(adj_ref[...], h_blk,
                          preferred_element_type=jnp.float32)


def gcn_conv_dense(adj, x, w, b, *, tm_cap=512, tk_cap=1024, tn_cap=512,
                   h_resident_budget=8 * 1024 * 1024):
    """out[i] = Adj @ (x[i] @ W + b) for every batch element i."""
    B, N, Cin = x.shape
    Chid = w.shape[1]

    chid_p = _round_up(Chid, 128)      # lane-dense hidden dim
    n_p = _round_up(N, 128)            # 128-granular node padding
    b_cols = B * chid_p                # batch folded into MXU columns

    # Zero-padded W columns / bias lanes stay exactly zero through both
    # matmuls and are sliced off at the end.
    w_p = jnp.zeros((Cin, chid_p), jnp.float32).at[:, :Chid].set(
        w.astype(jnp.float32))
    b_p = jnp.zeros((1, chid_p), jnp.float32).at[0, :Chid].set(
        b.astype(jnp.float32))

    # 128-granular node padding.  Padded Adj rows/cols are zero, so padded H
    # rows (== bias) contribute nothing; padded output rows are sliced off.
    if n_p != N:
        adj = jnp.pad(adj, ((0, n_p - N), (0, n_p - N)))
        x = jnp.pad(x, ((0, 0), (0, n_p - N), (0, 0)))

    adj_bf16 = adj.astype(jnp.bfloat16)
    x = x.astype(jnp.float32)

    # --- Stage 1: feature transform (tiny; computed exactly once) ----------
    tn = _pick_tile(n_p, tn_cap)
    h_cost = pl.CostEstimate(
        flops=2 * B * n_p * Cin * chid_p,
        transcendentals=0,
        bytes_accessed=4 * (B * n_p * Cin + Cin * chid_p + chid_p)
                       + 2 * n_p * b_cols,
    )
    h_cat = pl.pallas_call(
        functools.partial(_feature_transform_kernel, chid_p=chid_p),
        out_shape=jax.ShapeDtypeStruct((n_p, b_cols), jnp.bfloat16),
        grid_spec=pltpu.PrefetchScalarGridSpec(
            num_scalar_prefetch=0,
            grid=(n_p // tn,),
            in_specs=[
                pl.BlockSpec((B, tn, Cin), lambda i: (0, i, 0)),   # x row tile
                pl.BlockSpec((Cin, chid_p), lambda i: (0, 0)),     # W (shared)
                pl.BlockSpec((1, chid_p), lambda i: (0, 0)),       # bias
            ],
            out_specs=pl.BlockSpec((tn, b_cols), lambda i: (i, 0)),
        ),
        compiler_params=pltpu.CompilerParams(
            dimension_semantics=("parallel",),
            vmem_limit_bytes=48 * 1024 * 1024,
        ),
        cost_estimate=h_cost,
    )(x, w_p, b_p)

    # --- Stage 2: neighborhood aggregation Adj @ H_cat ---------------------
    tm = _pick_tile(n_p, tm_cap)
    if n_p >= 256 and n_p // tm < 2:
        # Ensure >= 2 blocks along the "parallel" row-tile axis (v7x: 2 TCs).
        tm = _pick_tile(n_p, n_p // 2)
    tk = _pick_tile(n_p, tk_cap)

    h_resident = n_p * b_cols * 2 <= h_resident_budget
    if h_resident:
        h_spec = pl.BlockSpec((n_p, b_cols), lambda i, k: (0, 0))
    else:
        h_spec = pl.BlockSpec((tk, b_cols), lambda i, k: (k, 0))

    n_row_tiles = n_p // tm
    mm_cost = pl.CostEstimate(
        flops=2 * n_p * n_p * b_cols,
        transcendentals=0,
        bytes_accessed=n_p * n_p * 2
                       + n_p * b_cols * 2 * (1 if h_resident else n_row_tiles)
                       + n_p * b_cols * 4,
    )

    out_cat = pl.pallas_call(
        functools.partial(_adj_matmul_kernel, tk=tk, h_resident=h_resident),
        out_shape=jax.ShapeDtypeStruct((n_p, b_cols), jnp.float32),
        grid_spec=pltpu.PrefetchScalarGridSpec(
            num_scalar_prefetch=0,
            grid=(n_p // tm, n_p // tk),                 # reduction axis last
            in_specs=[
                pl.BlockSpec((tm, tk), lambda i, k: (i, k)),   # Adj tile
                h_spec,                                        # H (resident or k-tiled)
            ],
            out_specs=pl.BlockSpec((tm, b_cols), lambda i, k: (i, 0)),
        ),
        compiler_params=pltpu.CompilerParams(
            dimension_semantics=("parallel", "arbitrary"),
            vmem_limit_bytes=48 * 1024 * 1024,
        ),
        cost_estimate=mm_cost,
    )(adj_bf16, h_cat)

    # (n_p, B*chid_p) -> (B, N, Chid): strip node/hidden padding, unfold batch.
    out = out_cat[:N].reshape(N, B, chid_p).transpose(1, 0, 2)[:, :, :Chid]
    return out


def gcn_forward(x, adj, params, dropout_adj_p=0.5, training=False):
    """GCN.forward for the sparse=False branch (eval mode)."""
    # nn.Dropout(p=dropout_adj) on Adj is the identity when training=False.
    # TODO(synk): training-mode adjacency dropout (PyTorch RNG) not replicated.
    del dropout_adj_p, training
    w, b = params[0]
    # Adj is logically stacked per batch; the kernel reuses the same tiles.
    return gcn_conv_dense(adj, x, w, b)


def _init_params(key, in_channels, hidden_channels):
    # Deterministic init mimicking nn.Linear's uniform(-1/sqrt(fan_in), ...).
    k_w, k_b = jax.random.split(key)
    bound = 1.0 / jnp.sqrt(in_channels)
    w = jax.random.uniform(k_w, (in_channels, hidden_channels),
                           jnp.float32, -bound, bound)
    b = jax.random.uniform(k_b, (hidden_channels,), jnp.float32, -bound, bound)
    return [(w, b)]


if __name__ == "__main__":
    B, N, C_IN, C_HID = 2, 32, 16, 32

    key = jax.random.PRNGKey(0)
    k_x, k_a, k_p = jax.random.split(key, 3)

    x = jax.random.normal(k_x, (B, N, C_IN), jnp.float32)
    # Dense adjacency (row-normalized, deterministic).
    a_raw = jax.random.uniform(k_a, (N, N), jnp.float32)
    adj = a_raw / jnp.sum(a_raw, axis=-1, keepdims=True)

    params = _init_params(k_p, C_IN, C_HID)

    out = gcn_forward(x, adj, params)
    out = jax.block_until_ready(out)

    # Reference check in plain JAX (f32).  Adj/H run through the MXU in bf16
    # with f32 accumulation, so tolerance is relaxed accordingly.
    w, b = params[0]
    ref = jnp.einsum("nm,bmh->bnh", adj, jnp.einsum("bnc,ch->bnh", x, w) + b)
    assert out.shape == (B, N, C_HID), out.shape
    assert jnp.allclose(out, ref, atol=2e-2, rtol=2e-2)

    print("KERNEL_OK")
</pallas_src>

<mosaic_0001>
module attributes {stable_mosaic.version = 11 : i64} {
  func.func @_feature_transform_kernel(%arg0: i32, %arg1: memref<2x128x16xf32, #tpu.memory_space<vmem>>, %arg2: memref<16x128xf32, #tpu.memory_space<vmem>>, %arg3: memref<1x128xf32, #tpu.memory_space<vmem>>, %arg4: memref<128x256xbf16, #tpu.memory_space<vmem>>) attributes {dimension_semantics = [#tpu.dimension_semantics<parallel>], iteration_bounds = array<i64: 1>, scalar_prefetch = 0 : i64, scratch_operands = 0 : i64, tpu.core_type = #tpu.core_type<tc>, window_params = [{transform_indices = @transform_0, window_bounds = array<i64: 2, 128, 16>}, {pipeline_mode = #tpu.pipeline_mode<synchronous>, transform_indices = @transform_1, window_bounds = array<i64: 16, 128>}, {pipeline_mode = #tpu.pipeline_mode<synchronous>, transform_indices = @transform_2, window_bounds = array<i64: 1, 128>}, {transform_indices = @transform_3, window_bounds = array<i64: 128, 256>}]} {
    %c0 = arith.constant 0 : index
    %c0_0 = arith.constant 0 : index
    %0 = vector.load %arg2[%c0, %c0_0] : memref<16x128xf32, #tpu.memory_space<vmem>>, vector<16x128xf32>
    %c0_1 = arith.constant 0 : index
    %c0_2 = arith.constant 0 : index
    %1 = vector.load %arg3[%c0_1, %c0_2] : memref<1x128xf32, #tpu.memory_space<vmem>>, vector<1x128xf32>
    %c0_3 = arith.constant 0 : index
    %c0_4 = arith.constant 0 : index
    %c0_5 = arith.constant 0 : index
    %2 = vector.load %arg1[%c0_3, %c0_4, %c0_5] : memref<2x128x16xf32, #tpu.memory_space<vmem>>, vector<1x128x16xf32>
    %3 = vector.shape_cast %2 : vector<1x128x16xf32> to vector<128x16xf32>
    %cst = arith.constant dense<0.000000e+00> : vector<128x128xf32>
    %4 = tpu.matmul %3, %0, %cst {dimension_numbers = #tpu.dot_dimension_numbers<[1], [0], [0], [1], [0, 0, 1, 1], [], []>} : vector<128x16xf32>, vector<16x128xf32>, vector<128x128xf32> -> vector<128x128xf32>
    %5 = vector.broadcast %1 : vector<1x128xf32> to vector<128x128xf32>
    %6 = arith.addf %4, %5 : vector<128x128xf32>
    %7 = arith.truncf %6 : vector<128x128xf32> to vector<128x128xbf16>
    %c0_6 = arith.constant 0 : index
    %c0_7 = arith.constant 0 : index
    %8 = vector.load %arg4[%c0_6, %c0_7] : memref<128x256xbf16, #tpu.memory_space<vmem>>, vector<128x128xbf16>
    tpu.vector_store %arg4[%c0_6, %c0_7], %7 {strides = array<i32>} : memref<128x256xbf16, #tpu.memory_space<vmem>>, vector<128x128xbf16>,
    %c1 = arith.constant 1 : index
    %c0_8 = arith.constant 0 : index
    %c0_9 = arith.constant 0 : index
    %9 = vector.load %arg1[%c1, %c0_8, %c0_9] : memref<2x128x16xf32, #tpu.memory_space<vmem>>, vector<1x128x16xf32>
    %10 = vector.shape_cast %9 : vector<1x128x16xf32> to vector<128x16xf32>
    %cst_10 = arith.constant dense<0.000000e+00> : vector<128x128xf32>
    %11 = tpu.matmul %10, %0, %cst_10 {dimension_numbers = #tpu.dot_dimension_numbers<[1], [0], [0], [1], [0, 0, 1, 1], [], []>} : vector<128x16xf32>, vector<16x128xf32>, vector<128x128xf32> -> vector<128x128xf32>
    %12 = vector.broadcast %1 : vector<1x128xf32> to vector<128x128xf32>
    %13 = arith.addf %11, %12 : vector<128x128xf32>
    %14 = arith.truncf %13 : vector<128x128xf32> to vector<128x128xbf16>
    %c0_11 = arith.constant 0 : index
    %c128 = arith.constant 128 : index
    %15 = vector.load %arg4[%c0_11, %c128] : memref<128x256xbf16, #tpu.memory_space<vmem>>, vector<128x128xbf16>
    tpu.vector_store %arg4[%c0_11, %c128], %14 {strides = array<i32>} : memref<128x256xbf16, #tpu.memory_space<vmem>>, vector<128x128xbf16>,
    return
  }
  func.func @transform_0(%arg0: i32) -> (i32, i32, i32) {
    %c0_i32 = arith.constant 0 : i32
    %c0_i32_0 = arith.constant 0 : i32
    %c0_i32_1 = arith.constant 0 : i32
    return %c0_i32, %arg0, %c0_i32_0 : i32, i32, i32
  }
  func.func @transform_1(%arg0: i32) -> (i32, i32) {
    %c0_i32 = arith.constant 0 : i32
    %c0_i32_0 = arith.constant 0 : i32
    %c0_i32_1 = arith.constant 0 : i32
    return %c0_i32, %c0_i32_0 : i32, i32
  }
  func.func @transform_2(%arg0: i32) -> (i32, i32) {
    %c0_i32 = arith.constant 0 : i32
    %c0_i32_0 = arith.constant 0 : i32
    %c0_i32_1 = arith.constant 0 : i32
    return %c0_i32, %c0_i32_0 : i32, i32
  }
  func.func @transform_3(%arg0: i32) -> (i32, i32) {
    %c0_i32 = arith.constant 0 : i32
    %c0_i32_0 = arith.constant 0 : i32
    return %arg0, %c0_i32 : i32, i32
  }
}

</mosaic_0001>

<bundles_post_ra>
// kernel: tpu_custom_call.1
= control target key start
LH: loop header
LB: loop body
LE: loop exit
PB: predicated region body
PF: predicated region fallthrough
CT: control target
= control target key end

     0   :  { %vm37_vm0 = vcmask 130048   ;;  %s642_s0 = inlined_call_operand.vmem [shape: f32[2,128,16], index: 0, kind: input, shape index: {}]   ;;  %s643_s1 = inlined_call_operand.vmem [shape: f32[16,128], index: 1, kind: input, shape index: {}]   ;;  %s644_s2 = inlined_call_operand.vmem [shape: f32[1,128], index: 2, kind: input, shape index: {}]   ;;  %s645_s3 = inlined_call_operand.hbm [shape: bf16[128,256], index: 3, kind: output, shape index: {}]  }
   0x1   :  { %v16_v0 = vld [vmem:[%s643_s1 + $0x8] sm:$0xff]  ;;  %v15_v1 = vld [vmem:[%s643_s1] sm:$0xff] }
   0x2   :  { %411 = vmatpush.msra.mxu2 %v16_v0  ;;  %413 = vmatpush.msra.mxu3 %v16_v0  ;;  %v26_v2 = vld [vmem:[%s642_s0 + $0x40] sm:$0xff] }
   0x3   :  { %v387_v3 = vld [vmem:[%s642_s0 + $0xc0] sm:$0xff]  ;;  %100 = vmatpush.msra.mxu0 %v16_v0  ;;  %262 = vmatpush.msra.mxu1 %v16_v0 }
   0x4   :  { %412 = vmatpush.msra.mxu2 %v15_v1  ;;  %414 = vmatpush.msra.mxu3 %v15_v1  ;;  %v18_v4 = vld [vmem:[%s642_s0] sm:$0xff] }
   0x5   :  { %v379_v5 = vld [vmem:[%s642_s0 + $0x80] sm:$0xff]  ;;  %371 = vmatmul.msk.f32.vlgmr.msra.gmra.mxu2 %vm37_vm0, %v26_v2  ;;  %403 = vmatmul.msk.f32.vlgmr.msra.gmra.mxu3 %vm37_vm0, %v387_v3 }
   0x6   :  { %101 = vmatpush.msra.mxu0 %v15_v1  ;;  %263 = vmatpush.msra.mxu1 %v15_v1 }
   0x7   :  { %363 = vmatmul.msk.f32.vlgmr.msra.gmra.mxu0 %vm37_vm0, %v18_v4  ;;  %395 = vmatmul.msk.f32.vlgmr.msra.gmra.mxu1 %vm37_vm0, %v379_v5 }
   0x8   :  { %8 = vsyncpa [#allocation3], 0  ;;  %v27_v6 = vld [vmem:[%s642_s0 + $0x48] sm:$0xff]  ;;  %v28_v10 = vld [vmem:[%s642_s0 + $0x50] sm:$0xff]  ;;  %s351_s27 = sshll.u32 %s645_s3, 4  ;;  %s446_s28 = smov 128   ;;  %s352_s27 = int_to_ptr.hbm [resolvable:$true] %s351_s27 }
   0x9   :  { %v388_v7 = vld [vmem:[%s642_s0 + $0xc8] sm:$0xff]  ;;  %v389_v11 = vld [vmem:[%s642_s0 + $0xd0] sm:$0xff]  ;;  %v29_v14 = vld [vmem:[%s642_s0 + $0x58] sm:$0xff]  ;;  %s447_s29 = smov 8  }
   0xa   :  { %v19_v8 = vld [vmem:[%s642_s0 + $0x8] sm:$0xff]  ;;  %v20_v12 = vld [vmem:[%s642_s0 + $0x10] sm:$0xff]  ;;  %v390_v15 = vld [vmem:[%s642_s0 + $0xd8] sm:$0xff] }
   0xb   :  { %v380_v9 = vld [vmem:[%s642_s0 + $0x88] sm:$0xff]  ;;  %v381_v13 = vld [vmem:[%s642_s0 + $0x90] sm:$0xff]  ;;  %v21_v16 = vld [vmem:[%s642_s0 + $0x18] sm:$0xff] }
   0xc   :  { %v382_v17 = vld [vmem:[%s642_s0 + $0x98] sm:$0xff]  ;;  %v30_v18 = vld [vmem:[%s642_s0 + $0x60] sm:$0xff]  ;;  %v31_v22 = vld [vmem:[%s642_s0 + $0x68] sm:$0xff] }
   0xd   :  { %372 = vmatmul.msk.f32.gmra.mxu2 %vm37_vm0, %v27_v6  ;;  %404 = vmatmul.msk.f32.gmra.mxu3 %vm37_vm0, %v388_v7  ;;  %v391_v19 = vld [vmem:[%s642_s0 + $0xe0] sm:$0xff]  ;;  %v392_v23 = vld [vmem:[%s642_s0 + $0xe8] sm:$0xff]  ;;  %v32_v26 = vld [vmem:[%s642_s0 + $0x70] sm:$0xff] }
   0xe   :  { %v22_v20 = vld [vmem:[%s642_s0 + $0x20] sm:$0xff]  ;;  %v23_v24 = vld [vmem:[%s642_s0 + $0x28] sm:$0xff]  ;;  %v393_v27 = vld [vmem:[%s642_s0 + $0xf0] sm:$0xff] }
   0xf   :  { %364 = vmatmul.msk.f32.gmra.mxu0 %vm37_vm0, %v19_v8  ;;  %396 = vmatmul.msk.f32.gmra.mxu1 %vm37_vm0, %v380_v9  ;;  %v383_v21 = vld [vmem:[%s642_s0 + $0xa0] sm:$0xff]  ;;  %v384_v25 = vld [vmem:[%s642_s0 + $0xa8] sm:$0xff]  ;;  %v24_v28 = vld [vmem:[%s642_s0 + $0x30] sm:$0xff] }
  0x10   :  { %v385_v29 = vld [vmem:[%s642_s0 + $0xb0] sm:$0xff]  ;;  %v33_v30 = vld [vmem:[%s642_s0 + $0x78] sm:$0xff]  ;;  %v605_v34 = vld [vmem:[%s644_s2] ss:$0 sm:$0xff] }
  0x11   :  { %v394_v31 = vld [vmem:[%s642_s0 + $0xf8] sm:$0xff] }
  0x12   :  { %v25_v32 = vld [vmem:[%s642_s0 + $0x38] sm:$0xff] }
  0x13   :  { %v386_v33 = vld [vmem:[%s642_s0 + $0xb8] sm:$0xff]  ;;  %s445_s0 = smov [#allocation2]  }
  0x14   :  { %s349_s2 = sshll.u32 %s445_s0, 4  ;;  %s350_s2 = int_to_ptr.vmem [resolvable:$true] %s349_s2 }
  0x15   :  { %373 = vmatmul.msk.f32.gmra.mxu2 %vm37_vm0, %v28_v10  ;;  %405 = vmatmul.msk.f32.gmra.mxu3 %vm37_vm0, %v389_v11 }
  0x17   :  { %365 = vmatmul.msk.f32.gmra.mxu0 %vm37_vm0, %v20_v12  ;;  %397 = vmatmul.msk.f32.gmra.mxu1 %vm37_vm0, %v381_v13 }
  0x1d   :  { %374 = vmatmul.msk.f32.gmra.mxu2 %vm37_vm0, %v29_v14  ;;  %406 = vmatmul.msk.f32.gmra.mxu3 %vm37_vm0, %v390_v15 }
  0x1f   :  { %366 = vmatmul.msk.f32.gmra.mxu0 %vm37_vm0, %v21_v16  ;;  %398 = vmatmul.msk.f32.gmra.mxu1 %vm37_vm0, %v382_v17 }
  0x25   :  { %375 = vmatmul.msk.f32.gmra.mxu2 %vm37_vm0, %v30_v18  ;;  %407 = vmatmul.msk.f32.gmra.mxu3 %vm37_vm0, %v391_v19 }
  0x27   :  { %367 = vmatmul.msk.f32.gmra.mxu0 %vm37_vm0, %v22_v20  ;;  %399 = vmatmul.msk.f32.gmra.mxu1 %vm37_vm0, %v383_v21 }
  0x2d   :  { %376 = vmatmul.msk.f32.gmra.mxu2 %vm37_vm0, %v31_v22  ;;  %408 = vmatmul.msk.f32.gmra.mxu3 %vm37_vm0, %v392_v23 }
  0x2f   :  { %368 = vmatmul.msk.f32.gmra.mxu0 %vm37_vm0, %v23_v24  ;;  %400 = vmatmul.msk.f32.gmra.mxu1 %vm37_vm0, %v384_v25 }
  0x35   :  { %377 = vmatmul.msk.f32.gmra.mxu2 %vm37_vm0, %v32_v26  ;;  %409 = vmatmul.msk.f32.gmra.mxu3 %vm37_vm0, %v393_v27 }
  0x37   :  { %369 = vmatmul.msk.f32.gmra.mxu0 %vm37_vm0, %v24_v28  ;;  %401 = vmatmul.msk.f32.gmra.mxu1 %vm37_vm0, %v385_v29 }
  0x3d   :  { %378 = vmatmul.msk.f32.gmra.mxu2 %vm37_vm0, %v33_v30  ;;  %410 = vmatmul.msk.f32.gmra.mxu3 %vm37_vm0, %v394_v31 }
  0x3f   :  { %370 = vmatmul.msk.f32.gmra.mxu0 %vm37_vm0, %v25_v32  ;;  %402 = vmatmul.msk.f32.gmra.mxu1 %vm37_vm0, %v386_v33 }
  0x84   :  { %v103_v35 = vpop.f32.mrf.mxu0  ;;  %v265_v36 = vpop.f32.mrf.mxu1 }
  0x85   :  { %v104_v37 = vadd.f32 %v605_v34, %v103_v35  ;;  %v266_v38 = vadd.f32 %v605_v34, %v265_v36 }
  0x87   :  { %v151_v39 = vpack.c.bf16 %v104_v37, %v104_v37  ;;  %v313_v40 = vpack.c.bf16 %v266_v38, %v266_v38 }
  0x88   :  { %v127_v41 = vpop.f32.mrf.mxu2  ;;  %v289_v42 = vpop.f32.mrf.mxu3 }
  0x89   :  { %167 = vst [vmem:[#allocation2] sm:$0xf] %v151_v39  ;;  %v128_v43 = vadd.f32 %v605_v34, %v127_v41  ;;  %v290_v44 = vadd.f32 %v605_v34, %v289_v42 }
  0x8a   :  { %329 = vst [vmem:[#allocation2 + $0x4] sm:$0xf] %v313_v40 }
  0x8b   :  { %v159_v45 = vpack.c.bf16 %v128_v43, %v128_v43  ;;  %v321_v46 = vpack.c.bf16 %v290_v44, %v290_v44 }
  0x8c   :  { %v106_v47 = vpop.f32.mrf.mxu0  ;;  %v268_v48 = vpop.f32.mrf.mxu1 }
  0x8d   :  { %175 = vst [vmem:[#allocation2 + $0x40] sm:$0xf] %v159_v45  ;;  %v107_v49 = vadd.f32 %v605_v34, %v106_v47  ;;  %v269_v50 = vadd.f32 %v605_v34, %v268_v48 }
  0x8e   :  { %337 = vst [vmem:[#allocation2 + $0x44] sm:$0xf] %v321_v46 }
  0x8f   :  { %v152_v51 = vpack.c.bf16 %v107_v49, %v107_v49  ;;  %v314_v52 = vpack.c.bf16 %v269_v50, %v269_v50 }
  0x90   :  { %v130_v53 = vpop.f32.mrf.mxu2  ;;  %v292_v54 = vpop.f32.mrf.mxu3 }
  0x91   :  { %168 = vst [vmem:[#allocation2 + $0x8] sm:$0xf] %v152_v51  ;;  %v131_v55 = vadd.f32 %v605_v34, %v130_v53  ;;  %v293_v56 = vadd.f32 %v605_v34, %v292_v54 }
  0x92   :  { %330 = vst [vmem:[#allocation2 + $0xc] sm:$0xf] %v314_v52 }
  0x93   :  { %v160_v57 = vpack.c.bf16 %v131_v55, %v131_v55  ;;  %v322_v58 = vpack.c.bf16 %v293_v56, %v293_v56 }
  0x94   :  { %v109_v59 = vpop.f32.mrf.mxu0  ;;  %v271_v60 = vpop.f32.mrf.mxu1 }
  0x95   :  { %176 = vst [vmem:[#allocation2 + $0x48] sm:$0xf] %v160_v57  ;;  %v110_v61 = vadd.f32 %v605_v34, %v109_v59  ;;  %v272_v62 = vadd.f32 %v605_v34, %v271_v60 }
  0x96   :  { %338 = vst [vmem:[#allocation2 + $0x4c] sm:$0xf] %v322_v58 }
  0x97   :  { %v153_v63 = vpack.c.bf16 %v110_v61, %v110_v61  ;;  %v315_v0 = vpack.c.bf16 %v272_v62, %v272_v62 }
  0x98   :  { %v133_v1 = vpop.f32.mrf.mxu2  ;;  %v295_v2 = vpop.f32.mrf.mxu3 }
  0x99   :  { %169 = vst [vmem:[#allocation2 + $0x10] sm:$0xf] %v153_v63  ;;  %v134_v3 = vadd.f32 %v605_v34, %v133_v1  ;;  %v296_v4 = vadd.f32 %v605_v34, %v295_v2 }
  0x9a   :  { %331 = vst [vmem:[#allocation2 + $0x14] sm:$0xf] %v315_v0 }
  0x9b   :  { %v161_v5 = vpack.c.bf16 %v134_v3, %v134_v3  ;;  %v323_v6 = vpack.c.bf16 %v296_v4, %v296_v4 }
  0x9c   :  { %v112_v7 = vpop.f32.mrf.mxu0  ;;  %v274_v8 = vpop.f32.mrf.mxu1 }
  0x9d   :  { %177 = vst [vmem:[#allocation2 + $0x50] sm:$0xf] %v161_v5  ;;  %v113_v9 = vadd.f32 %v605_v34, %v112_v7  ;;  %v275_v10 = vadd.f32 %v605_v34, %v274_v8 }
  0x9e   :  { %339 = vst [vmem:[#allocation2 + $0x54] sm:$0xf] %v323_v6 }
  0x9f   :  { %v154_v11 = vpack.c.bf16 %v113_v9, %v113_v9  ;;  %v316_v12 = vpack.c.bf16 %v275_v10, %v275_v10 }
  0xa0   :  { %v136_v13 = vpop.f32.mrf.mxu2  ;;  %v298_v14 = vpop.f32.mrf.mxu3 }
  0xa1   :  { %170 = vst [vmem:[#allocation2 + $0x18] sm:$0xf] %v154_v11  ;;  %v137_v15 = vadd.f32 %v605_v34, %v136_v13  ;;  %v299_v16 = vadd.f32 %v605_v34, %v298_v14 }
  0xa2   :  { %332 = vst [vmem:[#allocation2 + $0x1c] sm:$0xf] %v316_v12 }
  0xa3   :  { %v162_v17 = vpack.c.bf16 %v137_v15, %v137_v15  ;;  %v324_v18 = vpack.c.bf16 %v299_v16, %v299_v16 }
  0xa4   :  { %v115_v19 = vpop.f32.mrf.mxu0  ;;  %v277_v20 = vpop.f32.mrf.mxu1 }
  0xa5   :  { %178 = vst [vmem:[#allocation2 + $0x58] sm:$0xf] %v162_v17  ;;  %v116_v21 = vadd.f32 %v605_v34, %v115_v19  ;;  %v278_v22 = vadd.f32 %v605_v34, %v277_v20 }
  0xa6   :  { %340 = vst [vmem:[#allocation2 + $0x5c] sm:$0xf] %v324_v18 }
  0xa7   :  { %v155_v23 = vpack.c.bf16 %v116_v21, %v116_v21  ;;  %v317_v24 = vpack.c.bf16 %v278_v22, %v278_v22 }
  0xa8   :  { %v139_v25 = vpop.f32.mrf.mxu2  ;;  %v301_v26 = vpop.f32.mrf.mxu3 }
  0xa9   :  { %171 = vst [vmem:[#allocation2 + $0x20] sm:$0xf] %v155_v23  ;;  %v140_v27 = vadd.f32 %v605_v34, %v139_v25  ;;  %v302_v28 = vadd.f32 %v605_v34, %v301_v26 }
  0xaa   :  { %333 = vst [vmem:[#allocation2 + $0x24] sm:$0xf] %v317_v24 }
  0xab   :  { %v163_v29 = vpack.c.bf16 %v140_v27, %v140_v27  ;;  %v325_v30 = vpack.c.bf16 %v302_v28, %v302_v28 }
  0xac   :  { %v118_v31 = vpop.f32.mrf.mxu0  ;;  %v280_v32 = vpop.f32.mrf.mxu1 }
  0xad   :  { %179 = vst [vmem:[#allocation2 + $0x60] sm:$0xf] %v163_v29  ;;  %v119_v33 = vadd.f32 %v605_v34, %v118_v31  ;;  %v281_v35 = vadd.f32 %v605_v34, %v280_v32 }
  0xae   :  { %341 = vst [vmem:[#allocation2 + $0x64] sm:$0xf] %v325_v30 }
  0xaf   :  { %v156_v36 = vpack.c.bf16 %v119_v33, %v119_v33  ;;  %v318_v37 = vpack.c.bf16 %v281_v35, %v281_v35 }
  0xb0   :  { %v142_v38 = vpop.f32.mrf.mxu2  ;;  %v304_v39 = vpop.f32.mrf.mxu3 }
  0xb1   :  { %172 = vst [vmem:[#allocation2 + $0x28] sm:$0xf] %v156_v36  ;;  %v143_v40 = vadd.f32 %v605_v34, %v142_v38  ;;  %v305_v41 = vadd.f32 %v605_v34, %v304_v39 }
  0xb2   :  { %334 = vst [vmem:[#allocation2 + $0x2c] sm:$0xf] %v318_v37 }
  0xb3   :  { %v164_v42 = vpack.c.bf16 %v143_v40, %v143_v40  ;;  %v326_v43 = vpack.c.bf16 %v305_v41, %v305_v41 }
  0xb4   :  { %v121_v44 = vpop.f32.mrf.mxu0  ;;  %v283_v45 = vpop.f32.mrf.mxu1 }
  0xb5   :  { %180 = vst [vmem:[#allocation2 + $0x68] sm:$0xf] %v164_v42  ;;  %v122_v46 = vadd.f32 %v605_v34, %v121_v44  ;;  %v284_v47 = vadd.f32 %v605_v34, %v283_v45 }
  0xb6   :  { %342 = vst [vmem:[#allocation2 + $0x6c] sm:$0xf] %v326_v43 }
  0xb7   :  { %v157_v48 = vpack.c.bf16 %v122_v46, %v122_v46  ;;  %v319_v49 = vpack.c.bf16 %v284_v47, %v284_v47 }
  0xb8   :  { %v145_v50 = vpop.f32.mrf.mxu2  ;;  %v307_v51 = vpop.f32.mrf.mxu3 }
  0xb9   :  { %173 = vst [vmem:[#allocation2 + $0x30] sm:$0xf] %v157_v48  ;;  %v146_v52 = vadd.f32 %v605_v34, %v145_v50  ;;  %v308_v53 = vadd.f32 %v605_v34, %v307_v51 }
  0xba   :  { %335 = vst [vmem:[#allocation2 + $0x34] sm:$0xf] %v319_v49 }
  0xbb   :  { %v165_v54 = vpack.c.bf16 %v146_v52, %v146_v52  ;;  %v327_v55 = vpack.c.bf16 %v308_v53, %v308_v53 }
  0xbc   :  { %v124_v56 = vpop.f32.mrf.mxu0  ;;  %v286_v57 = vpop.f32.mrf.mxu1 }
  0xbd   :  { %181 = vst [vmem:[#allocation2 + $0x70] sm:$0xf] %v165_v54  ;;  %v125_v58 = vadd.f32 %v605_v34, %v124_v56  ;;  %v287_v59 = vadd.f32 %v605_v34, %v286_v57 }
  0xbe   :  { %343 = vst [vmem:[#allocation2 + $0x74] sm:$0xf] %v327_v55 }
  0xbf   :  { %v158_v60 = vpack.c.bf16 %v125_v58, %v125_v58  ;;  %v320_v61 = vpack.c.bf16 %v287_v59, %v287_v59 }
  0xc0   :  { %v148_v62 = vpop.f32.mrf.mxu2  ;;  %v310_v63 = vpop.f32.mrf.mxu3 }
  0xc1   :  { %174 = vst [vmem:[#allocation2 + $0x38] sm:$0xf] %v158_v60  ;;  %v149_v0 = vadd.f32 %v605_v34, %v148_v62  ;;  %v311_v1 = vadd.f32 %v605_v34, %v310_v63 }
  0xc2   :  { %336 = vst [vmem:[#allocation2 + $0x3c] sm:$0xf] %v320_v61 }
  0xc3   :  { %v166_v2 = vpack.c.bf16 %v149_v0, %v149_v0  ;;  %v328_v3 = vpack.c.bf16 %v311_v1, %v311_v1 }
  0xc5   :  { %182 = vst [vmem:[#allocation2 + $0x78] sm:$0xf] %v166_v2 }
  0xc6   :  { %344 = vst [vmem:[#allocation2 + $0x7c] sm:$0xf] %v328_v3 }
  0xc7   :  { %357 = dma.vmem_to_hbm [thread:$0]  %s350_s2, 2048, %s352_s27, [#allocation3], %s446_s28, %s446_s28, %s447_s29  }
  0xc8   :  { %443 = dma.done.wait [#allocation3], 2048  }
  0xc9   :  { %444 = vsyncadd [#allocation3], 4294965248 }
  0xca   :  { %362 = vsyncpa [#allocation3], 1 }

</bundles_post_ra>
